<compile_context>
chip_gen: v5e
topology: v5e:2x2
jax: 0.10.0
libtpu: 0.0.40
codegen_flags: <defaults>
</compile_context>

<pallas_src>
import jax
import jax.numpy as jnp
from jax.experimental import pallas as pl
from jax.experimental.pallas import tpu as pltpu

# ---- small synthetic config (stand-ins for VOCAB_SIZE / 300 / 1024) ----
VOCAB_SIZE = 50
WORD_DIM = 32      # word_dim  (300 -> pad to 384 at real config)
QUES_DIM = 128     # ques_dim  (1024 in the real model); 128 keeps slices lane-dense
BATCH = 16         # batch; split across 2 batch blocks (v7x: one per TensorCore)
SEQ = 8
NUM_BATCH_BLOCKS = 2


# --------------------------------------------------------------------------
# Fused GRU kernel: one grid step == one (batch_block, time) pair.
#   gi = x_t @ W_ih + b_ih'   (b_ih' has b_hr, b_hz folded in)
#   gh = h   @ W_hh
#   r,z = sigmoid(gi[:, :2H] + gh[:, :2H])        (one fused sigmoid)
#   n   = tanh(gi[:, 2H:] + r * (gh[:, 2H:] + b_hn))
#   h   = n + z * (h - n)
# h carry is the VMEM-resident output block (same block index across the
# serial time axis); initialized at t == 0.
# --------------------------------------------------------------------------
def fused_gru_kernel(x_ref, wih_ref, whh_ref, bih_ref, bhn_ref, h_ref):
    t = pl.program_id(1)
    H = h_ref.shape[1]

    @pl.when(t == 0)
    def _init():
        h_ref[...] = jnp.zeros_like(h_ref)

    h = h_ref[...]                                   # (Bt, H) f32 carry
    x_t = x_ref[0]                                   # (Bt, D) bf16, streamed slab

    gi = jnp.dot(x_t, wih_ref[...],
                 preferred_element_type=jnp.float32) + bih_ref[...]     # (Bt, 3H)
    gh = jnp.dot(h.astype(jnp.bfloat16), whh_ref[...],
                 preferred_element_type=jnp.float32)                    # (Bt, 3H)

    rz = jax.nn.sigmoid(gi[:, :2 * H] + gh[:, :2 * H])   # fused r|z sigmoid (EUP)
    r = rz[:, :H]
    z = rz[:, H:]
    n = jnp.tanh(gi[:, 2 * H:] + r * (gh[:, 2 * H:] + bhn_ref[...]))    # EUP
    h_ref[...] = n + z * (h - n)


def gru_forward(x_bf16, w_ih_bf16, w_hh_bf16, b_fused, b_hn,
                *, num_batch_blocks=1):
    """x_bf16: (S, B, D) bf16.  Returns final hidden state (B, H) f32."""
    S, B, D = x_bf16.shape
    H = w_hh_bf16.shape[0]
    NB = num_batch_blocks
    assert B % NB == 0, "batch must divide evenly into batch blocks"
    Bt = B // NB

    # Advisory cost hint (helps XLA overlap the embedding gather with this call).
    flops = int(S * (2 * B * D * 3 * H + 2 * B * H * 3 * H + 10 * B * H))
    transcendentals = int(S * B * 3 * H)
    bytes_accessed = int(
        x_bf16.size * 2 + w_ih_bf16.size * 2 + w_hh_bf16.size * 2
        + b_fused.size * 4 + b_hn.size * 4 + B * H * 4)

    grid_spec = pltpu.PrefetchScalarGridSpec(
        num_scalar_prefetch=0,
        grid=(NB, S),
        in_specs=[
            # per-step x slab, pipelined / double-buffered over the time axis
            pl.BlockSpec((1, Bt, D), lambda c, t: (t, c, 0)),
            # weights & biases: constant block index -> DMA'd once, VMEM-resident
            pl.BlockSpec((D, 3 * H), lambda c, t: (0, 0)),
            pl.BlockSpec((H, 3 * H), lambda c, t: (0, 0)),
            pl.BlockSpec((1, 3 * H), lambda c, t: (0, 0)),
            pl.BlockSpec((1, H), lambda c, t: (0, 0)),
        ],
        # h accumulator: same block across the serial time axis
        out_specs=pl.BlockSpec((Bt, H), lambda c, t: (c, 0)),
    )

    return pl.pallas_call(
        fused_gru_kernel,
        out_shape=jax.ShapeDtypeStruct((B, H), jnp.float32),
        grid_spec=grid_spec,
        compiler_params=pltpu.CompilerParams(
            # batch blocks independent (v7x megacore); time is a serial carry
            dimension_semantics=("parallel", "arbitrary"),
            vmem_limit_bytes=32 * 1024 * 1024,
        ),
        cost_estimate=pl.CostEstimate(flops=flops,
                                      transcendentals=transcendentals,
                                      bytes_accessed=bytes_accessed),
    )(x_bf16, w_ih_bf16, w_hh_bf16, b_fused, b_hn)


# --------------------------------------------------------------------------
# Forward pass mirroring QuestionParser.forward:
#   questions.t() -> embedding -> GRU -> last-layer hidden -> dropout(eval)
# --------------------------------------------------------------------------
def question_parser_forward(questions, embd_w, w_ih, w_hh, b_ih, b_hh,
                            *, num_batch_blocks=1):
    """questions: (batch, seq) int32 token ids.  Returns (batch, ques_dim) f32."""
    H = w_hh.shape[0]
    q_t = questions.T                        # (seq, batch)
    # TODO(synk): embedding gather kept as an XLA gather; could be folded into
    # the kernel via PrefetchScalarGridSpec row-gather for a modest extra win.
    x = embd_w[q_t]                          # (S, B, D) f32

    # Fold b_hr, b_hz into the input-side bias (only b_hn must stay inside the
    # r * (W_hn h + b_hn) term per PyTorch GRU semantics).
    b_fused = b_ih.at[:, :2 * H].add(b_hh[:, :2 * H])   # (1, 3H)
    b_hn = b_hh[:, 2 * H:]                              # (1, H)

    h = gru_forward(x.astype(jnp.bfloat16),
                    w_ih.astype(jnp.bfloat16),
                    w_hh.astype(jnp.bfloat16),
                    b_fused, b_hn,
                    num_batch_blocks=num_batch_blocks)

    # TODO(synk): nn.Dropout is identity in eval mode; training-mode stochastic
    # dropout (pltpu.prng_*) intentionally not applied.
    return h


# --------------------------------------------------------------------------
# Pure-JAX f32 reference (PyTorch GRU semantics, gate order r, z, n).
# --------------------------------------------------------------------------
def gru_reference(x, w_ih, w_hh, b_ih, b_hh):
    B = x.shape[1]
    H = w_hh.shape[0]

    def step(h, x_t):
        gi = x_t @ w_ih + b_ih
        gh = h @ w_hh + b_hh
        r = jax.nn.sigmoid(gi[:, :H] + gh[:, :H])
        z = jax.nn.sigmoid(gi[:, H:2 * H] + gh[:, H:2 * H])
        n = jnp.tanh(gi[:, 2 * H:] + r * gh[:, 2 * H:])
        return (1.0 - z) * n + z * h, None

    h0 = jnp.zeros((B, H), jnp.float32)
    h_last, _ = jax.lax.scan(step, h0, x)
    return h_last


if __name__ == "__main__":
    key = jax.random.PRNGKey(0)
    k_emb, k_wih, k_whh, k_bih, k_bhh, k_q = jax.random.split(key, 6)

    # Deterministic synthetic parameters (glove init replaced by random init).
    embd_w = 0.1 * jax.random.normal(k_emb, (VOCAB_SIZE + 1, WORD_DIM), jnp.float32)
    embd_w = embd_w.at[VOCAB_SIZE].set(0.0)   # padding_idx=VOCAB_SIZE row is zero

    # Concatenated (pre-transposed) GRU weights, gate order (r | z | n).
    w_ih = 0.1 * jax.random.normal(k_wih, (WORD_DIM, 3 * QUES_DIM), jnp.float32)
    w_hh = 0.1 * jax.random.normal(k_whh, (QUES_DIM, 3 * QUES_DIM), jnp.float32)
    b_ih = 0.1 * jax.random.normal(k_bih, (1, 3 * QUES_DIM), jnp.float32)
    b_hh = 0.1 * jax.random.normal(k_bhh, (1, 3 * QUES_DIM), jnp.float32)

    # questions: (batch, seq) ids in [0, VOCAB_SIZE] (VOCAB_SIZE == padding idx)
    questions = jax.random.randint(k_q, (BATCH, SEQ), 0, VOCAB_SIZE + 1, jnp.int32)

    q_emb = question_parser_forward(questions, embd_w, w_ih, w_hh, b_ih, b_hh,
                                    num_batch_blocks=NUM_BATCH_BLOCKS)
    q_emb = jax.block_until_ready(q_emb)

    # correctness check against pure-f32 JAX reference
    # (tolerance accounts for bf16 MXU operands with f32 accumulation)
    x = embd_w[questions.T]
    ref = gru_reference(x, w_ih, w_hh, b_ih, b_hh)
    assert q_emb.shape == (BATCH, QUES_DIM)
    assert jnp.allclose(q_emb, ref, atol=2e-2, rtol=2e-2), float(
        jnp.max(jnp.abs(q_emb - ref)))

    print("KERNEL_OK")
</pallas_src>

<mosaic_0001>
module attributes {stable_mosaic.version = 11 : i64} {
  func.func @fused_gru_kernel(%arg0: i32, %arg1: i32, %arg2: memref<1x8x32xbf16, #tpu.memory_space<vmem>>, %arg3: memref<32x384xbf16, #tpu.memory_space<vmem>>, %arg4: memref<128x384xbf16, #tpu.memory_space<vmem>>, %arg5: memref<1x384xf32, #tpu.memory_space<vmem>>, %arg6: memref<1x128xf32, #tpu.memory_space<vmem>>, %arg7: memref<8x128xf32, #tpu.memory_space<vmem>>) attributes {dimension_semantics = [#tpu.dimension_semantics<parallel>, #tpu.dimension_semantics<arbitrary>], iteration_bounds = array<i64: 2, 8>, scalar_prefetch = 0 : i64, scratch_operands = 0 : i64, tpu.core_type = #tpu.core_type<tc>, window_params = [{transform_indices = @transform_0, window_bounds = array<i64: 1, 8, 32>}, {pipeline_mode = #tpu.pipeline_mode<synchronous>, transform_indices = @transform_1, window_bounds = array<i64: 32, 384>}, {pipeline_mode = #tpu.pipeline_mode<synchronous>, transform_indices = @transform_2, window_bounds = array<i64: 128, 384>}, {pipeline_mode = #tpu.pipeline_mode<synchronous>, transform_indices = @transform_3, window_bounds = array<i64: 1, 384>}, {pipeline_mode = #tpu.pipeline_mode<synchronous>, transform_indices = @transform_4, window_bounds = array<i64: 1, 128>}, {transform_indices = @transform_5, window_bounds = array<i64: 8, 128>}]} {
    %c0_i32 = arith.constant 0 : i32
    %0 = arith.cmpi eq, %arg1, %c0_i32 : i32
    %1 = arith.extui %0 : i1 to i32
    %c0_i32_0 = arith.constant 0 : i32
    %2 = arith.cmpi ne, %1, %c0_i32_0 : i32
    scf.if %2 {
      %cst_17 = arith.constant 0.000000e+00 : f32
      %36 = vector.broadcast %cst_17 : f32 to vector<8x128xf32>
      %c0_18 = arith.constant 0 : index
      %c0_19 = arith.constant 0 : index
      %37 = vector.load %arg7[%c0_18, %c0_19] : memref<8x128xf32, #tpu.memory_space<vmem>>, vector<8x128xf32>
      tpu.vector_store %arg7[%c0_18, %c0_19], %36 {strides = array<i32>} : memref<8x128xf32, #tpu.memory_space<vmem>>, vector<8x128xf32>,
    } else {
    }
    %c0 = arith.constant 0 : index
    %c0_1 = arith.constant 0 : index
    %3 = vector.load %arg7[%c0, %c0_1] : memref<8x128xf32, #tpu.memory_space<vmem>>, vector<8x128xf32>
    %c0_2 = arith.constant 0 : index
    %c0_3 = arith.constant 0 : index
    %c0_4 = arith.constant 0 : index
    %4 = vector.load %arg2[%c0_2, %c0_3, %c0_4] : memref<1x8x32xbf16, #tpu.memory_space<vmem>>, vector<1x8x32xbf16>
    %5 = vector.shape_cast %4 : vector<1x8x32xbf16> to vector<8x32xbf16>
    %c0_5 = arith.constant 0 : index
    %c0_6 = arith.constant 0 : index
    %6 = vector.load %arg3[%c0_5, %c0_6] : memref<32x384xbf16, #tpu.memory_space<vmem>>, vector<32x384xbf16>
    %cst = arith.constant dense<0.000000e+00> : vector<8x384xf32>
    %7 = tpu.matmul %5, %6, %cst {dimension_numbers = #tpu.dot_dimension_numbers<[1], [0], [0], [1], [0, 0, 1, 1], [], []>} : vector<8x32xbf16>, vector<32x384xbf16>, vector<8x384xf32> -> vector<8x384xf32>
    %c0_7 = arith.constant 0 : index
    %c0_8 = arith.constant 0 : index
    %8 = vector.load %arg5[%c0_7, %c0_8] : memref<1x384xf32, #tpu.memory_space<vmem>>, vector<1x384xf32>
    %9 = vector.broadcast %8 : vector<1x384xf32> to vector<8x384xf32>
    %10 = arith.addf %7, %9 : vector<8x384xf32>
    %11 = arith.truncf %3 : vector<8x128xf32> to vector<8x128xbf16>
    %c0_9 = arith.constant 0 : index
    %c0_10 = arith.constant 0 : index
    %12 = vector.load %arg4[%c0_9, %c0_10] : memref<128x384xbf16, #tpu.memory_space<vmem>>, vector<128x384xbf16>
    %cst_11 = arith.constant dense<0.000000e+00> : vector<8x384xf32>
    %13 = tpu.matmul %11, %12, %cst_11 {dimension_numbers = #tpu.dot_dimension_numbers<[1], [0], [0], [1], [0, 0, 1, 1], [], []>} : vector<8x128xbf16>, vector<128x384xbf16>, vector<8x384xf32> -> vector<8x384xf32>
    %14 = vector.extract_strided_slice %10 {offsets = [0, 0], sizes = [8, 256], strides = [1, 1]} : vector<8x384xf32> to vector<8x256xf32>
    %15 = vector.extract_strided_slice %13 {offsets = [0, 0], sizes = [8, 256], strides = [1, 1]} : vector<8x384xf32> to vector<8x256xf32>
    %16 = arith.addf %14, %15 : vector<8x256xf32>
    %17 = arith.negf %16 : vector<8x256xf32>
    %18 = math.exp %17 : vector<8x256xf32>
    %cst_12 = arith.constant 1.000000e+00 : f32
    %19 = vector.broadcast %cst_12 : f32 to vector<8x256xf32>
    %20 = arith.addf %19, %18 : vector<8x256xf32>
    %21 = arith.divf %19, %20 : vector<8x256xf32>
    %22 = vector.extract_strided_slice %21 {offsets = [0, 0], sizes = [8, 128], strides = [1, 1]} : vector<8x256xf32> to vector<8x128xf32>
    %23 = vector.extract_strided_slice %21 {offsets = [0, 128], sizes = [8, 128], strides = [1, 1]} : vector<8x256xf32> to vector<8x128xf32>
    %24 = vector.extract_strided_slice %10 {offsets = [0, 256], sizes = [8, 128], strides = [1, 1]} : vector<8x384xf32> to vector<8x128xf32>
    %25 = vector.extract_strided_slice %13 {offsets = [0, 256], sizes = [8, 128], strides = [1, 1]} : vector<8x384xf32> to vector<8x128xf32>
    %c0_13 = arith.constant 0 : index
    %c0_14 = arith.constant 0 : index
    %26 = vector.load %arg6[%c0_13, %c0_14] : memref<1x128xf32, #tpu.memory_space<vmem>>, vector<1x128xf32>
    %27 = vector.broadcast %26 : vector<1x128xf32> to vector<8x128xf32>
    %28 = arith.addf %25, %27 : vector<8x128xf32>
    %29 = arith.mulf %22, %28 : vector<8x128xf32>
    %30 = arith.addf %24, %29 : vector<8x128xf32>
    %31 = math.tanh %30 : vector<8x128xf32>
    %32 = arith.subf %3, %31 : vector<8x128xf32>
    %33 = arith.mulf %23, %32 : vector<8x128xf32>
    %34 = arith.addf %31, %33 : vector<8x128xf32>
    %c0_15 = arith.constant 0 : index
    %c0_16 = arith.constant 0 : index
    %35 = vector.load %arg7[%c0_15, %c0_16] : memref<8x128xf32, #tpu.memory_space<vmem>>, vector<8x128xf32>
    tpu.vector_store %arg7[%c0_15, %c0_16], %34 {strides = array<i32>} : memref<8x128xf32, #tpu.memory_space<vmem>>, vector<8x128xf32>,
    return
  }
  func.func @transform_0(%arg0: i32, %arg1: i32) -> (i32, i32, i32) {
    %c0_i32 = arith.constant 0 : i32
    %c0_i32_0 = arith.constant 0 : i32
    return %arg1, %arg0, %c0_i32 : i32, i32, i32
  }
  func.func @transform_1(%arg0: i32, %arg1: i32) -> (i32, i32) {
    %c0_i32 = arith.constant 0 : i32
    %c0_i32_0 = arith.constant 0 : i32
    %c0_i32_1 = arith.constant 0 : i32
    return %c0_i32, %c0_i32_0 : i32, i32
  }
  func.func @transform_2(%arg0: i32, %arg1: i32) -> (i32, i32) {
    %c0_i32 = arith.constant 0 : i32
    %c0_i32_0 = arith.constant 0 : i32
    %c0_i32_1 = arith.constant 0 : i32
    return %c0_i32, %c0_i32_0 : i32, i32
  }
  func.func @transform_3(%arg0: i32, %arg1: i32) -> (i32, i32) {
    %c0_i32 = arith.constant 0 : i32
    %c0_i32_0 = arith.constant 0 : i32
    %c0_i32_1 = arith.constant 0 : i32
    return %c0_i32, %c0_i32_0 : i32, i32
  }
  func.func @transform_4(%arg0: i32, %arg1: i32) -> (i32, i32) {
    %c0_i32 = arith.constant 0 : i32
    %c0_i32_0 = arith.constant 0 : i32
    %c0_i32_1 = arith.constant 0 : i32
    return %c0_i32, %c0_i32_0 : i32, i32
  }
  func.func @transform_5(%arg0: i32, %arg1: i32) -> (i32, i32) {
    %c0_i32 = arith.constant 0 : i32
    %c0_i32_0 = arith.constant 0 : i32
    return %arg0, %c0_i32 : i32, i32
  }
}

</mosaic_0001>

<bundles_post_ra>
// kernel: tpu_custom_call.1
= control target key start
LH: loop header
LB: loop body
LE: loop exit
PB: predicated region body
PF: predicated region fallthrough
CT: control target
= control target key end

     0   :  { %s1648_s0 = inlined_call_operand.hbm [shape: bf16[8,16,32], index: 0, kind: input, shape index: {}]   ;;  %s1649_s1 = inlined_call_operand.hbm [shape: bf16[32,384], index: 1, kind: input, shape index: {}]   ;;  %s1650_s2 = inlined_call_operand.hbm [shape: bf16[128,384], index: 2, kind: input, shape index: {}]   ;;  %s1651_s3 = inlined_call_operand.hbm [shape: f32[1,384], index: 3, kind: input, shape index: {}]   ;;  %s1652_s4 = inlined_call_operand.vmem [shape: f32[1,128], index: 4, kind: input, shape index: {}]   ;;  %s1653_s5 = inlined_call_operand.hbm [shape: f32[16,128], index: 5, kind: output, shape index: {}]  }
   0x1   :  { %1658 = sst [smem:[#allocation20_spill]] %s1649_s1 }
   0x2   :  { %1659 = sst [smem:[#allocation21_spill]] %s1650_s2 }
   0x3   :  { %1660 = sst [smem:[#allocation22_spill]] %s1651_s3 }
   0x4   :  { %10 = vsyncpa [#allocation3], 0 }
   0x5   :  { %12 = vsyncpa [#allocation3 + $0x1], 0 }
   0x6   :  { %13 = vsyncpa [#allocation6], 0 }
   0x7   :  { %14 = vsyncpa [#allocation9], 0 }
   0x8   :  { %15 = vsyncpa [#allocation4], 0 }
   0x9   :  { %17 = vsyncpa [#allocation4 + $0x1], 0  ;;  %s1396_s18 = smov 0   ;;  %s1398_s19 = smov 0  }
   0xa   :  { %s1400_s20 = smov 0   ;;  %s1402_s21 = smov 0  }
   0xb   :  { %s1404_s22 = smov 0   ;;  %s1406_s23 = smov 0  }
   0xc   :  { %s1408_s24 = smov 0   ;;  %s1410_s25 = smov 0  }
   0xd   :  { %s1412_s26 = smov 0   ;;  %s1414_s27 = smov 0  }
   0xe   :  { %s1416_s28 = smov 0  }
   0xf LB: > { %1661 = sst [smem:[#allocation15_spill]] %s1318_s18  ;;  %s785_s29 = sadd.s32 4294967295, %s1358_s28   ;;  %s1358_s28 = sphi %s1416_s28, %s23_s28   ;;  %s1354_s27 = sphi %s1414_s27, %s1690_s27   ;;  %s1350_s26 = sphi %s1412_s26, %s1689_s26   ;;  %s1346_s25 = sphi %s1410_s25, %s1688_s25   ;;  %s1342_s24 = sphi %s1408_s24, %s1687_s24   ;;  %s1338_s23 = sphi %s1406_s23, %s1686_s23   ;;  %s1334_s22 = sphi %s1404_s22, %s1685_s22   ;;  %s1330_s21 = sphi %s1402_s21, %s1684_s21   ;;  %s1326_s20 = sphi %s1400_s20, %s1679_s20   ;;  %s1322_s19 = sphi %s1398_s19, %s1683_s19   ;;  %s1318_s18 = sphi %s1396_s18, %s1682_s18  }
  0x10   : > { %1662 = sst [smem:[#allocation16_spill]] %s1326_s20  ;;  %p787_p0 = scmp.ge.s32.totalorder %s1358_s28, 1 }
  0x11   : > { %p1453_p1 = scmp.eq.s32.totalorder %s785_s29, 0  ;;  %p1457_p2 = scmp.eq.s32.totalorder %s785_s29, 15 }
  0x12   : > { %p178_p3 = scmp.lt.s32.totalorder %s1358_s28, 17  ;;  %s1665_s1 = sld [smem:[#allocation20_spill]] }
  0x13   : > { %s1360_s11 = smov [#allocation5]   ;;  %s1668_s2 = sld [smem:[#allocation21_spill]] }
  0x14   : > { %p1465_p4 = pnand %p787_p0, %p178_p3  ;;  %s191_s12 = sshll.u32 %s1360_s11, 4  ;;  %s192_s12 = int_to_ptr.vmem [resolvable:$true] %s191_s12 }
  0x15   : > { %s1361_s17 = smov [#allocation7]   ;;  %s1362_s7 = smov 192  }
  0x16   : > { %p977_p5 = pneg %p1465_p4  ;;  %s205_s29 = sshll.u32 %s1361_s17, 4  ;;  %s206_s29 = int_to_ptr.vmem [resolvable:$true] %s205_s29 }
  0x17   : > { %s1363_s8 = smov 12   ;;  %s1669_s3 = sld [smem:[#allocation22_spill]] }
  0x18   : > { %s189_s9 = sshll.u32 %s1665_s1, 4  ;;  %p1473_p6 = pnand %p977_p5, %p1453_p1  ;;  %s190_s9 = int_to_ptr.hbm [resolvable:$true] %s189_s9 }
  0x19   : > { %s203_s16 = sshll.u32 %s1668_s2, 4  ;;  %s1364_s17 = smov [#allocation8]   ;;  %s204_s16 = int_to_ptr.hbm [resolvable:$true] %s203_s16 }
  0x1a   : > { %980 = dma.hbm_to_vmem [thread:$0]  (!%p1473_p6), %s190_s9, 768, %s192_s12, [#allocation6], %s1362_s7, %s1362_s7, %s1363_s8  }
  0x1b   : > { %983 = dma.hbm_to_vmem [thread:$0]  (!%p1473_p6), %s204_s16, 3072, %s206_s29, [#allocation6], %s1362_s7, %s1362_s7, %s1363_s8  }
  0x1c   : > { %s220_s1 = sshll.u32 %s1364_s17, 4  ;;  %s786_s9 = sadd.s32 4294967294, %s1358_s28   ;;  %s221_s1 = int_to_ptr.vmem [resolvable:$true] %s220_s1 }
  0x1d   : > { %s218_s15 = sshll.u32 %s1669_s3, 4  ;;  %s32_s12 = sadd.s32 1, %s1350_s26  ;;  %s219_s15 = int_to_ptr.hbm [resolvable:$true] %s218_s15 }
  0x1e   : > { %986 = dma.hbm_to_vmem [thread:$0]  (!%p1473_p6), %s219_s15, 48, %s221_s1, [#allocation9]  }
  0x1f   : > { %p33_p7 = scmp.ge.s32.totalorder %s32_s12, 8  ;;  %s35_s11 = sadd.s32 1, %s1354_s27 }
  0x20   : > { %s44_s16 = sadd.s32 1, %s1338_s23  ;;  %p51_p8 = scmp.ne.s32.totalorder %s1338_s23, %s1334_s22 }
  0x21   : > { %s1692_s12 = smov (%p33_p7, %s32_s12), 0  ;;  %s1694_s11 = smov (!%p33_p7, %s35_s11), %s1354_s27 }
  0x22   : > { %1670 = sst [smem:[#allocation17_spill]] %s1692_s12  ;;  %s39_s13 = ssub.s32 %s1350_s26, %s1692_s12 }
  0x23   : > { %p52_p9 = scmp.eq.s32.totalorder %s1358_s28, 0  ;;  %p37_p10 = scmp.ge.s32.totalorder %s1694_s11, 2 }
  0x24   : > { %p57_p11 = scmp.ne.s32.totalorder %s1334_s22, %s1330_s21  ;;  %s154_s29 = sadd.s32 1, %s1326_s20 }
  0x25   : > { %p1503_p12 = por %p52_p9, %p51_p8  ;;  %s1696_s11 = smov (%p37_p10, %s1694_s11), 0 }
  0x26   : > { %1672 = sst [smem:[#allocation18_spill]] %s1696_s11  ;;  %p1512_p13 = por %p1453_p1, %p57_p11 }
  0x27   : > { %p164_p0 = scmp.ne.s32.totalorder %s1326_s20, %s1322_s19  ;;  %s40_s8 = ssub.s32 %s1354_s27, %s1696_s11 }
  0x28   : > { %p170_p3 = scmp.ne.s32.totalorder %s1322_s19, %s1318_s18  ;;  %s41_s21 = sor.u32 %s40_s8, %s39_s13 }
  0x29   : > { %p152_p5 = scmp.eq.s32.totalorder %s40_s8, 0  ;;  %p42_p6 = scmp.eq.s32.totalorder %s41_s21, 0 }
  0x2a   : > { %p1524_p7 = por %p1457_p2, %p164_p0  ;;  %p171_p8 = scmp.eq.s32.totalorder %s786_s9, 15 }
  0x2b   : > { %s1529_s15 = scalar_select %p152_p5, %s1326_s20, %s154_s29  }
  0x2c   : > { %s1532_s17 = scalar_select %p42_p6, %s1338_s23, %s44_s16  }
  0x2d   : > { %1675 = sst [smem:[#allocation19_spill]] %s1529_s15  ;;  %p998_p9 = scmp.lt.s32.totalorder %s1358_s28, 16 }
  0x2e   : > { %s234_s2 = sand.u32 1, %s1338_s23   ;;  %s793_s3 = sshll.u32 %s1350_s26, 1 }
  0x2f   : > { %p1537_p10 = por %p171_p8, %p170_p3  ;;  %s792_s13 = sshll.u32 %s234_s2, 2 }
  0x30   : > { %s242_s6 = sadd.s32 %s1354_s27, %s793_s3  ;;  %s238_s15 = scalar_lea.vmem [#allocation2], %s792_s13 }
  0x31   : > { %s794_s8 = sshll.u32 %s242_s6, 2  ;;  %s248_s20 = sshll.u32 %s238_s15, 4  ;;  %s249_s20 = int_to_ptr.vmem [resolvable:$true] %s248_s20 }
  0x32   : > { %s244_s29 = scalar_lea.hbm %s1648_s0, %s794_s8  ;;  %p988_p2 = pnand %p998_p9, %p1503_p12 }
  0x33   : > { %s246_s18 = sshll.u32 %s244_s29, 4  ;;  %s235_s9 = scalar_lea.sflag [#allocation3], %s234_s2  ;;  %s247_s18 = int_to_ptr.hbm [resolvable:$true] %s246_s18 }
  0x34   : > { %990 = dma.hbm_to_vmem [thread:$0]  (!%p988_p2), %s247_s18, 64, %s249_s20, %s235_s9  }
  0x35   : > { %257 = sbr.rel (%p1465_p4) target bundleno = 288 (0x120), region = 40  ;;  %s259_s3 = sand.u32 (!%p1465_p4), 1, %s1334_s22  }
  0x36   : > { %s1552_s16 = sshll.u32 (!%p1465_p4), %s259_s3, 2  ;;  %s260_s12 = scalar_lea.sflag (!%p1465_p4), [#allocation3], %s259_s3 }
  0x37   : > { %s263_s13 = scalar_lea.vmem (!%p1465_p4), [#allocation2], %s1552_s16 }
  0x3a   : > { %1301 = dma.done.wait (%p1512_p13), %s260_s12, 64  }
  0x3b   : > { %1303 = vsyncadd (%p1512_p13), %s260_s12, 4294967232 }
  0x3c   : > { %1305 = dma.done.wait (%p1453_p1), [#allocation6], 3840  }
  0x3d   : > { %1307 = vsyncadd (%p1453_p1), [#allocation6], 4294963456 }
  0x3e   : > { %1309 = dma.done.wait (%p1453_p1), [#allocation9], 48  }
  0x3f   : > { %1311 = vsyncadd (%p1453_p1), [#allocation9], 4294967248  ;;  %s303_s2 = sand.u32 1, %s1322_s19   ;;  %p801_p4 = scmp.ne.s32.totalorder %s1342_s24, 0 }
  0x40   : > { %s800_s18 = sshll.u32 %s303_s2, 3 }
  0x41   : > { %s1570_s20 = scalar_lea.vmem [#allocation10], %s800_s18  ;;  %310 = sbr.rel (%p801_p4) target bundleno = 72 (0x48), region = 60 }
  0x46   : > { %v1365_v0 = vmov 0.0  }
  0x47   : > { %311 = vst [vmem:[%s1570_s20] sm:$0xff] %v1365_v0 }
  0x48 PF: > { %v915_v1 = vld [vmem:[#allocation7 + $0xa8] sm:$0xf]  ;;  %v959_v2 = vld [vmem:[#allocation7 + $0xb0] sm:$0xf0]  ;;  %v903_v3 = vld [vmem:[#allocation7 + $0x90] sm:$0xf] }
  0x49   : > { %v916_v4 = vor.u32 %v959_v2, %v915_v1  ;;  %v956_v5 = vld [vmem:[#allocation7 + $0x98] sm:$0xf0]  ;;  %v958_v6 = vld [vmem:[#allocation7 + $0xac] sm:$0xf]  ;;  %v917_v7 = vld [vmem:[#allocation7 + $0xb4] sm:$0xf0] }
  0x4a   : > { %v920_v8 = vor.u32 %v958_v6, %v917_v7  ;;  %v955_v9 = vld [vmem:[#allocation7 + $0x94] sm:$0xf]  ;;  %v904_v10 = vor.u32 %v956_v5, %v903_v3  ;;  %v891_v11 = vld [vmem:[#allocation7 + $0x78] sm:$0xf]  ;;  %v905_v12 = vld [vmem:[#allocation7 + $0x9c] sm:$0xf0] }
  0x4b   : > { %566 = vmatpush.bf16.msra.mxu3 %v916_v4  ;;  %v953_v13 = vld [vmem:[#allocation7 + $0x80] sm:$0xf0]  ;;  %v908_v14 = vor.u32 %v955_v9, %v905_v12  ;;  %v816_v15 = vld [vmem:[#allocation5 + $0x18] sm:$0xf]  ;;  %v935_v16 = vld [vmem:[#allocation5 + $0x20] sm:$0xf0] }
  0x4c   : > { %579 = vmatpush.bf16.msra.mxu0 %v920_v8  ;;  %v817_v17 = vor.u32 %v935_v16, %v816_v15  ;;  %v952_v18 = vld [vmem:[#allocation7 + $0x7c] sm:$0xf]  ;;  %v893_v19 = vld [vmem:[#allocation7 + $0x84] sm:$0xf0]  ;;  %v804_v20 = vld [vmem:[#allocation5] sm:$0xf]  ;;  %v892_v22 = vor.u32 %v953_v13, %v891_v11 }
  0x4d   : > { %v932_v21 = vld [vmem:[#allocation5 + $0x8] sm:$0xf0]  ;;  %v879_v24 = vld [vmem:[#allocation7 + $0x60] sm:$0xf]  ;;  %v950_v25 = vld [vmem:[#allocation7 + $0x68] sm:$0xf0]  ;;  %v896_v26 = vor.u32 %v952_v18, %v893_v19 }
  0x4e   : > { %372 = vmatpush.bf16.msra.mxu2 %v817_v17  ;;  %v805_v23 = vor.u32 %v932_v21, %v804_v20  ;;  %v934_v27 = vld [vmem:[#allocation5 + $0x1c] sm:$0xf]  ;;  %v949_v28 = vld [vmem:[#allocation7 + $0x64] sm:$0xf]  ;;  %v881_v29 = vld [vmem:[#allocation7 + $0x6c] sm:$0xf0]  ;;  %v880_v34 = vor.u32 %v950_v25, %v879_v24 }
  0x4f   : > { %567 = vmatpush.bf16.msra.mxu3 %v904_v10  ;;  %v818_v30 = vld [vmem:[#allocation5 + $0x24] sm:$0xf0]  ;;  %v867_v31 = vld [vmem:[#allocation7 + $0x48] sm:$0xf]  ;;  %v931_v33 = vld [vmem:[#allocation5 + $0x4] sm:$0xf]  ;;  %v884_v38 = vor.u32 %v949_v28, %v881_v29 }
  0x50   : > { %580 = vmatpush.bf16.msra.mxu0 %v908_v14  ;;  %v821_v32 = vor.u32 %v934_v27, %v818_v30  ;;  %v1576_v35 = vld [vmem:[%s263_s13] sm:$0xf]  ;;  %vm362_vm0 = vcmask 261120   ;;  %v806_v36 = vld [vmem:[#allocation5 + $0xc] sm:$0xf0]  ;;  %s928_s10 = sshll.u32 %s1346_s25, 3 }
  0x51   : > { %v947_v37 = vld [vmem:[#allocation7 + $0x50] sm:$0xf0]  ;;  %v809_v39 = vor.u32 %v931_v33, %v806_v36  ;;  %v923_v40 = vld [vmem:[#allocation7 + $0xb0] sm:$0xf]  ;;  %v960_v41 = vld [vmem:[#allocation7 + $0xb8] sm:$0xf0]  ;;  %s668_s15 = scalar_lea.hbm %s1653_s5, %s928_s10 }
  0x52   : > { %373 = vmatpush.bf16.msra.mxu2 %v805_v23  ;;  %385 = vmatpush.bf16.msra.mxu1 %v821_v32  ;;  %v946_v42 = vld [vmem:[#allocation7 + $0x4c] sm:$0xf]  ;;  %v869_v43 = vld [vmem:[#allocation7 + $0x54] sm:$0xf0]  ;;  %v924_v44 = vor.u32 %v960_v41, %v923_v40  ;;  %v957_v46 = vld [vmem:[#allocation7 + $0xa0] sm:$0xf0]  ;;  %v868_v47 = vor.u32 %v947_v37, %v867_v31 }
  0x53   : > { %568 = vmatpush.bf16.msra.mxu3 %v892_v22  ;;  %v911_v45 = vld [vmem:[#allocation7 + $0x98] sm:$0xf]  ;;  %v855_v48 = vld [vmem:[#allocation7 + $0x30] sm:$0xf]  ;;  %v944_v49 = vld [vmem:[#allocation7 + $0x38] sm:$0xf0]  ;;  %v872_v50 = vor.u32 %v946_v42, %v869_v43 }
  0x54   : > { %581 = vmatpush.bf16.msra.mxu0 %v896_v26  ;;  %v943_v51 = vld [vmem:[#allocation7 + $0x34] sm:$0xf]  ;;  %v857_v52 = vld [vmem:[#allocation7 + $0x3c] sm:$0xf0]  ;;  %v912_v53 = vor.u32 %v957_v46, %v911_v45  ;;  %v824_v54 = vld [vmem:[#allocation5 + $0x20] sm:$0xf]  ;;  %v856_v60 = vor.u32 %v944_v49, %v855_v48 }
  0x55   : > { %826 = vmatmul.msk.bf16.vlgmr.msra.gmra.mxu2 %vm362_vm0, %v1576_v35  ;;  %v936_v55 = vld [vmem:[#allocation5 + $0x28] sm:$0xf0]  ;;  %v899_v56 = vld [vmem:[#allocation7 + $0x80] sm:$0xf]  ;;  %v954_v57 = vld [vmem:[#allocation7 + $0x88] sm:$0xf0]  ;;  %v860_v0 = vor.u32 %v943_v51, %v857_v52 }
  0x56   : > { %386 = vmatpush.bf16.msra.mxu1 %v809_v39  ;;  %v825_v58 = vor.u32 %v936_v55, %v824_v54  ;;  %v812_v59 = vld [vmem:[#allocation5 + $0x8] sm:$0xf]  ;;  %v933_v61 = vld [vmem:[#allocation5 + $0x10] sm:$0xf0]  ;;  %v940_v2 = vld [vmem:[#allocation7 + $0x1c] sm:$0xf]  ;;  %v900_v4 = vor.u32 %v954_v57, %v899_v56 }
  0x57   : > { %569 = vmatpush.bf16.msra.mxu3 %v880_v34  ;;  %v843_v62 = vld [vmem:[#allocation7 + $0x18] sm:$0xf]  ;;  %v941_v63 = vld [vmem:[#allocation7 + $0x20] sm:$0xf0]  ;;  %v813_v1 = vor.u32 %v933_v61, %v812_v59  ;;  %v845_v3 = vld [vmem:[#allocation7 + $0x24] sm:$0xf0] }
  0x58   : > { %582 = vmatpush.bf16.msra.mxu0 %v884_v38  ;;  %398 = vmatpush.bf16.msrb.mxu2 %v825_v58  ;;  %v887_v5 = vld [vmem:[#allocation7 + $0x68] sm:$0xf]  ;;  %v951_v6 = vld [vmem:[#allocation7 + $0x70] sm:$0xf0]  ;;  %v844_v7 = vor.u32 %v941_v63, %v843_v62  ;;  %v831_v8 = vld [vmem:[#allocation7] sm:$0xf]  ;;  %v848_v10 = vor.u32 %v940_v2, %v845_v3 }
  0x59   : > { %827 = vmatmul.msk.bf16.vlgmr.msra.gmra.mxu1 %vm362_vm0, %v1576_v35  ;;  %v938_v9 = vld [vmem:[#allocation7 + $0x8] sm:$0xf0]  ;;  %v937_v11 = vld [vmem:[#allocation7 + $0x4] sm:$0xf]  ;;  %v833_v12 = vld [vmem:[#allocation7 + $0xc] sm:$0xf0]  ;;  %v888_v13 = vor.u32 %v951_v6, %v887_v5 }
  0x5a   : > { %592 = vmatpush.bf16.msrb.mxu1 %v924_v44  ;;  %v875_v14 = vld [vmem:[#allocation7 + $0x50] sm:$0xf]  ;;  %v948_v15 = vld [vmem:[#allocation7 + $0x58] sm:$0xf0]  ;;  %v832_v16 = vor.u32 %v938_v9, %v831_v8  ;;  %v836_v18 = vor.u32 %v937_v11, %v833_v12  ;;  %v863_v21 = vld [vmem:[#allocation7 + $0x38] sm:$0xf] }
  0x5b   : > { %570 = vmatpush.bf16.msra.mxu3 %v868_v47  ;;  %v1583_v17 = vld [vmem:[%s1570_s20] sm:$0xff]  ;;  %v876_v19 = vor.u32 %v948_v15, %v875_v14  ;;  %v851_v24 = vld [vmem:[#allocation7 + $0x20] sm:$0xf]  ;;  %v939_v28 = vld [vmem:[#allocation7 + $0x10] sm:$0xf0]  ;;  %s670_s6 = sshll.u32 %s1570_s20, 4  ;;  %s671_s6 = int_to_ptr.vmem [resolvable:$true] %s670_s6 }
  0x5c   : > { %583 = vmatpush.bf16.msra.mxu0 %v872_v50  ;;  %399 = vmatpush.bf16.msrb.mxu2 %v813_v1  ;;  %v405_v20 = vpack.c.bf16 %v1583_v17, %v1583_v17  ;;  %v945_v22 = vld [vmem:[#allocation7 + $0x40] sm:$0xf0]  ;;  %v942_v25 = vld [vmem:[#allocation7 + $0x28] sm:$0xf0]  ;;  %v839_v27 = vld [vmem:[#allocation7 + $0x8] sm:$0xf] }
  0x5d   : > { %v864_v23 = vor.u32 %v945_v22, %v863_v21  ;;  %v852_v26 = vor.u32 %v942_v25, %v851_v24  ;;  %v840_v29 = vor.u32 %v939_v28, %v839_v27  ;;  %v322_v32 = vld [vmem:[#allocation8] sm:$0x7]  ;;  %v1097_v59 = vld [vmem:[%s1652_s4] ss:$0 sm:$0xff]  ;;  %s672_s8 = sshll.u32 %s668_s15, 4  ;;  %s658_s25 = scalar_lea.sflag [#allocation4], %s303_s2  ;;  %s673_s8 = int_to_ptr.hbm [resolvable:$true] %s672_s8 }
  0x5e   : > { %593 = vmatpush.bf16.msrb.mxu1 %v912_v53  ;;  %v324_v37 = vperm.slane %v322_v32, 0  ;;  %s1242_s21 = sshra.s32 %s673_s8, 4  ;;  %s1248_s16 = scalar_lea.hbm %s1653_s5, 16  ;;  %s1243_s21 = int_to_ptr.hbm [resolvable:$true] %s1242_s21 }
  0x5f   : > { %571 = vmatpush.bf16.msra.mxu3 %v856_v60  ;;  %s1244_s29 = scalar_lea.hbm %s1243_s21, 8  ;;  %p1249_p13 = scmp.lt.s32.totalorder %s1243_s21, %s1653_s5 }
  0x60   : > { %584 = vmatpush.bf16.msra.mxu0 %v860_v0  ;;  %v326_v0 = vperm.slane %v322_v32, 2  ;;  %p1245_p1 = scmp.ne.s32.totalorder %s1243_s21, %s1244_s29  ;;  %p1250_p0 = scmp.lt.s32.totalorder %s1248_s16, %s1244_s29 }
  0x62   : > { %594 = vmatpush.bf16.msrb.mxu1 %v900_v4  ;;  %p1246_p11 = pnand %p1245_p1, %p1524_p7  ;;  %p1251_p3 = por %p1250_p0, %p1249_p13 }
  0x63   : > { %572 = vmatpush.bf16.msra.mxu3 %v844_v7 }
  0x64   : > { %585 = vmatpush.bf16.msra.mxu0 %v848_v10  ;;  %p1247_p12 = pneg %p1246_p11 }
  0x65   : > { %828 = vmatmul.msk.bf16.vlgmr.msrb.gmra.mxu2 %vm362_vm0, %v1576_v35  ;;  %v325_v35 = vperm.slane %v322_v32, 1 }
  0x66   : > { %595 = vmatpush.bf16.msrb.mxu1 %v888_v13  ;;  %p1252_p5 = pnand %p1251_p3, %p1247_p12 }
  0x67   : > { %573 = vmatpush.bf16.msra.mxu3 %v832_v16 }
  0x68   : > { %586 = vmatpush.bf16.msra.mxu0 %v836_v18 }
  0x6a   : > { %596 = vmatpush.bf16.msrb.mxu1 %v876_v19  ;;  %574 = vmatmul.bf16.vlgmr.msra.gmra.mxu3 %v405_v20 }
  0x6b   : > { %587 = vmatmul.bf16.vlgmr.msra.gmra.mxu0 %v405_v20 }
  0x6e   : > { %597 = vmatpush.bf16.msrb.mxu1 %v864_v23 }
  0x72   : > { %598 = vmatpush.bf16.msrb.mxu1 %v852_v26 }
  0x76   : > { %599 = vmatpush.bf16.msrb.mxu1 %v840_v29 }
  0x79   : > { %600 = vmatmul.bf16.vlgmr.msrb.gmra.mxu1 %v405_v20 }
  0xd6   : > { %v388_v30 = vpop.f32.mrf.mxu1 }
  0xd7   : > { %v389_v36 = vadd.f32 %v388_v30, %v325_v35 }
  0xd8   : > { %v375_v31 = vpop.f32.mrf.mxu2 }
  0xd9   : > { %v376_v41 = vadd.f32 %v375_v31, %v324_v37 }
  0xde   : > { %v390_v33 = vpop.f32.mrf.mxu1 }
  0xe0   : > { %v377_v34 = vpop.f32.mrf.mxu2 }
  0xe8   : > { %v588_v38 = vpop.f32.mrf.mxu0  ;;  %v401_v40 = vpop.f32.mrf.mxu2 }
  0xe9   : > { %v606_v39 = vadd.f32 %v588_v38, %v389_v36  ;;  %v402_v6 = vadd.f32 %v401_v40, %v326_v0 }
  0xeb   : > { %v926_v42 = vmul.f32 -1.442695, %v606_v39 }
  0xed   : > { %v575_v43 = vpop.f32.mrf.mxu3  ;;  %1098 = vpow2.f32 %v926_v42 }
  0xee   : > { %v605_v44 = vadd.f32 %v575_v43, %v376_v41 }
  0xf0   : > { %v925_v45 = vmul.f32 -1.442695, %v605_v44  ;;  %v590_v46 = vpop.f32.mrf.mxu0  ;;  %v403_v47 = vpop.f32.mrf.mxu2 }
  0xf2   : > { %1100 = vpow2.f32 %v925_v45 }
  0xf3   : > { %v1099_v48 = vpop.eup %1098 }
  0xf4   : > { %v614_v52 = vadd.f32 1.0, %v1099_v48 }
  0xf5   : > { %v577_v49 = vpop.f32.mrf.mxu3 }
  0xf6   : > { %v601_v50 = vpop.f32.mrf.mxu1  ;;  %vm635_vm5 = vweird.f32 %v614_v52  ;;  %v641_v11 = vand.u32 2147483648, %v614_v52  ;;  %v639_v13 = vand.u32 2147483647, %v614_v52 }
  0xf7   : > { %v649_v2 = vadd.f32 %v1097_v59, %v601_v50 }
  0xf8   : > { %v1101_v51 = vpop.eup %1100  ;;  %v642_v14 = vor.u32 1.1754944e-38, %v641_v11  ;;  %vm640_vm8 = vcmp.eq.f32.partialorder %v639_v13, 8.507059e+37 }
  0xf9   : > { %v613_v53 = vadd.f32 1.0, %v1101_v51 }
  0xfb   : > { %1102 = vrcp.f32 %v613_v53  ;;  %v626_v61 = vand.u32 2147483648, %v613_v53  ;;  %v624_v63 = vand.u32 2147483647, %v613_v53  ;;  %vm620_vm2 = vweird.f32 %v613_v53 }
  0xfc   : > { %1104 = vrcp.f32 %v614_v52 }
  0xfd   : > { %v627_v4 = vor.u32 1.1754944e-38, %v626_v61  ;;  %vm625_vm4 = vcmp.eq.f32.partialorder %v624_v63, 8.507059e+37 }
  0xfe   : > { %v603_v54 = vpop.f32.mrf.mxu1 }
 0x101   : > { %v1103_v55 = vpop.eup %1102 }
 0x102   : > { %v1105_v56 = vpop.eup %1104  ;;  %v616_v57 = vmul.f32 %v1103_v55, %v613_v53  ;;  %vm621_vm1 = vweird.f32 %v1103_v55 }
 0x103   : > { %v631_v60 = vmul.f32 %v1105_v56, %v614_v52  ;;  %vm622_vm3 = vmor %vm620_vm2, %vm621_vm1  ;;  %vm636_vm6 = vweird.f32 %v1105_v56 }
 0x104   : > { %v617_v58 = vsub.f32 1.0, %v616_v57  ;;  %vm637_vm7 = vmor %vm635_vm5, %vm636_vm6 }
 0x105   : > { %v632_v3 = vsub.f32 1.0, %v631_v60 }
 0x106   : > { %v618_v62 = vmul.f32 %v1103_v55, %v617_v58 }
 0x107   : > { %v633_v9 = vmul.f32 %v1105_v56, %v632_v3 }
 0x108   : > { %v619_v1 = vadd.f32 %v1103_v55, %v618_v62 }
 0x109   : > { %v634_v12 = vadd.f32 %v1105_v56, %v633_v9 }
 0x10a   : > { %v623_v5 = vsel %vm622_vm3, %v1103_v55, %v619_v1 }
 0x10b   : > { %v628_v7 = vsel %vm625_vm4, %v627_v4, %v623_v5  ;;  %v638_v15 = vsel %vm637_vm7, %v1105_v56, %v634_v12 }
 0x10c   : > { %v650_v8 = vmul.f32 %v649_v2, %v628_v7  ;;  %v643_v19 = vsel %vm640_vm8, %v642_v14, %v638_v15 }
 0x10e   : > { %v651_v10 = vadd.f32 %v650_v8, %v402_v6 }
 0x110   : > { %1106 = vtanh.f32 %v651_v10 }
 0x116   : > { %v1107_v16 = vpop.eup %1106 }
 0x117   : > { %v653_v18 = vsub.f32 %v1583_v17, %v1107_v16 }
 0x119   : > { %v654_v20 = vmul.f32 %v653_v18, %v643_v19 }
 0x11b   : > { %v655_v21 = vadd.f32 %v1107_v16, %v654_v20 }
 0x11d   : > { %656 = vst [vmem:[%s1570_s20] sm:$0xff] %v655_v21 }
 0x11e   : > { %1255 = shalt.err (!%p1252_p5)
}
 0x11f   : > { %975 = dma.vmem_to_hbm [thread:$0]  (%p1524_p7), %s671_s6, 128, %s673_s8, %s658_s25  }
 0x120 PF: > { %s1677_s2 = sld [smem:[#allocation15_spill]]  ;;  %p1002_p6 = scmp.ge.s32.totalorder %s1358_s28, 2 }
 0x122   : > { %p992_p8 = pnand %p1002_p6, %p1537_p10 }
 0x124   : > { %p993_p9 = pneg %p992_p8 }
 0x126   : > { %s684_s18 = sand.u32 1, %s1677_s2  }
 0x127   : > { %s685_s20 = scalar_lea.sflag [#allocation4], %s684_s18 }
 0x128   : > { %1313 = dma.done.wait (%p993_p9), %s685_s20, 128  }
 0x129   : > { %1315 = vsyncadd (%p993_p9), %s685_s20, 4294967168  ;;  %s23_s28 = sadd.s32 1, %s1358_s28   ;;  %s1678_s24 = sld [smem:[#allocation16_spill]] }
 0x12a   : > { %p20_p2 = scmp.ge.s32.totalorder %s23_s28, 18   ;;  %s1679_s20 = sld [smem:[#allocation19_spill]] }
 0x12b   : > { %s1680_s14 = sld [smem:[#allocation17_spill]]  ;;  %s1682_s18 = smov %s1322_s19 }
 0x12c   : > { %s1681_s30 = sld [smem:[#allocation18_spill]]  ;;  %s1684_s21 = smov %s1334_s22 }
 0x12d   : > { %s1685_s22 = smov %s1338_s23  ;;  %s1686_s23 = smov %s1532_s17 }
 0x12e   : > { %s1688_s25 = smov %s1354_s27  ;;  %22 = sbr.rel (!%p20_p2) target bundleno = 15 (0xf), region = 101 }
 0x12f   : > { %s1683_s19 = smov %s1678_s24  ;;  %s1687_s24 = smov %s1350_s26 }
 0x131   : > { %s1689_s26 = smov %s1680_s14 }
 0x132   : > { %s1690_s27 = smov %s1681_s30 }
 0x133   :  { %691 = vsyncpa [#allocation3], 1 }
 0x134   :  { %693 = vsyncpa [#allocation3 + $0x1], 1 }
 0x135   :  { %694 = vsyncpa [#allocation6], 1 }
 0x136   :  { %695 = vsyncpa [#allocation9], 1 }
 0x137   :  { %696 = vsyncpa [#allocation4], 1 }
 0x138   :  { %698 = vsyncpa [#allocation4 + $0x1], 1 }

</bundles_post_ra>
